<compile_context>
chip_gen: v6e
topology: v6e:2x2x1
jax: 0.10.0
libtpu: 0.0.40
codegen_flags: <defaults>
</compile_context>

<pallas_src>
import jax
import jax.numpy as jnp
from jax.experimental import pallas as pl
from jax.experimental.pallas import tpu as pltpu


def _make_pa_kernel(C):
    def kernel(w_ref, b_ref, x_ref, o_ref):
        # w_ref: (C, C) SMEM, w[oc, ic]; b_ref: (C,) SMEM
        # x_ref, o_ref: (C, T, 128) VMEM (batch dim squeezed by BlockSpec)
        xs = [x_ref[ic].astype(jnp.float32) for ic in range(C)]  # dense (T, 128) each
        for oc in range(C):
            acc = b_ref[oc] + w_ref[oc, 0] * xs[0]
            for ic in range(1, C):
                acc = acc + w_ref[oc, ic] * xs[ic]
            y = jax.nn.sigmoid(acc)            # EUP
            o_ref[oc] = (xs[oc] * y).astype(o_ref.dtype)
    return kernel


def _choose_spatial_tiling(S, max_rows):
    """Tile spatial as (rows of 128 lanes). Returns (T_rows, padded_S)."""
    s_blocks = (S + 127) // 128               # number of 128-lane rows (ceil)
    if s_blocks <= max_rows:
        return s_blocks, s_blocks * 128        # single spatial block per batch
    # Prefer a sublane-dense row count (multiple of 8) that divides s_blocks.
    cand = max_rows - max_rows % 8
    while cand >= 8:
        if s_blocks % cand == 0:
            return cand, s_blocks * 128
        cand -= 8
    # Otherwise pad s_blocks up to a multiple of a sublane-dense tile.
    t = max(8, max_rows - max_rows % 8)
    s_blocks_pad = ((s_blocks + t - 1) // t) * t
    return t, s_blocks_pad * 128


def pa_forward(x_nchw, weight_oihw, bias, *, max_block_bytes=2 * 1024 * 1024):
    """x_nchw: (N, C, H, W). weight_oihw: (C, C, 1, 1). bias: (C,)."""
    N, C, H, W = x_nchw.shape
    S = H * W

    w = weight_oihw[:, :, 0, 0].astype(jnp.float32)   # (out_ch, in_ch)
    b = bias.astype(jnp.float32)                      # (C,)

    # Rows-of-128 budget so one (C, T, 128) f32 block stays under max_block_bytes.
    max_rows = max(8, max_block_bytes // (C * 128 * 4))
    t_rows, s_pad = _choose_spatial_tiling(S, max_rows)

    x3 = x_nchw.reshape(N, C, S)                      # free view
    if s_pad != S:
        x3 = jnp.pad(x3, ((0, 0), (0, 0), (0, s_pad - S)))
    s_blocks = s_pad // 128
    x4 = x3.reshape(N, C, s_blocks, 128)              # free view (row-major)

    grid = (N, s_blocks // t_rows)

    out4 = pl.pallas_call(
        _make_pa_kernel(C),
        out_shape=jax.ShapeDtypeStruct((N, C, s_blocks, 128), x_nchw.dtype),
        grid_spec=pltpu.PrefetchScalarGridSpec(
            num_scalar_prefetch=0,
            grid=grid,
            in_specs=[
                # Grid-invariant params live in SMEM (no per-step DMA / double-buffer).
                pl.BlockSpec(memory_space=pltpu.MemorySpace.SMEM),  # weight (C, C)
                pl.BlockSpec(memory_space=pltpu.MemorySpace.SMEM),  # bias   (C,)
                # Sublane/lane-dense spatial tile; batch dim squeezed out of the kernel ref.
                pl.BlockSpec((None, C, t_rows, 128), lambda n, s: (n, 0, s, 0)),
            ],
            out_specs=pl.BlockSpec((None, C, t_rows, 128), lambda n, s: (n, 0, s, 0)),
        ),
        compiler_params=pltpu.CompilerParams(
            dimension_semantics=("parallel", "parallel"),
        ),
    )(w, b, x4)

    out3 = out4.reshape(N, C, s_pad)
    if s_pad != S:
        out3 = out3[:, :, :S]
    return out3.reshape(N, C, H, W)


def pa_reference(x_nchw, weight_oihw, bias):
    # Pure-JAX reference of the PyTorch forward.
    y = jax.lax.conv_general_dilated(
        x_nchw, weight_oihw, window_strides=(1, 1), padding="VALID",
        dimension_numbers=("NCHW", "OIHW", "NCHW"),
    ) + bias.reshape(1, -1, 1, 1)
    y = jax.nn.sigmoid(y)
    return x_nchw * y


if __name__ == "__main__":
    key = jax.random.PRNGKey(0)
    k_x, k_w, k_b = jax.random.split(key, 3)

    N, nf, H, W = 2, 4, 16, 16
    x = jax.random.normal(k_x, (N, nf, H, W), dtype=jnp.float32)
    # Deterministic synthetic parameters (Conv2d(nf, nf, 1) shapes).
    weight = jax.random.normal(k_w, (nf, nf, 1, 1), dtype=jnp.float32) * 0.1
    bias = jax.random.normal(k_b, (nf,), dtype=jnp.float32) * 0.1

    out = pa_forward(x, weight, bias)
    out = jax.block_until_ready(out)

    ref = pa_reference(x, weight, bias)
    assert out.shape == (N, nf, H, W)
    assert jnp.allclose(out, ref, atol=1e-5, rtol=1e-5), "mismatch vs reference"

    print("KERNEL_OK")
</pallas_src>

<mosaic_0001>
module attributes {stable_mosaic.version = 11 : i64} {
  func.func @kernel(%arg0: i32, %arg1: i32, %arg2: memref<4x4xf32, #tpu.memory_space<smem>>, %arg3: memref<4xf32, #tpu.memory_space<smem>>, %arg4: memref<1x4x2x128xf32, #tpu.memory_space<vmem>>, %arg5: memref<1x4x2x128xf32, #tpu.memory_space<vmem>>) attributes {dimension_semantics = [#tpu.dimension_semantics<parallel>, #tpu.dimension_semantics<parallel>], iteration_bounds = array<i64: 2, 1>, scalar_prefetch = 0 : i64, scratch_operands = 0 : i64, tpu.core_type = #tpu.core_type<tc>, window_params = [{transform_indices = @transform_0, window_bounds = array<i64: 4, 4>}, {transform_indices = @transform_1, window_bounds = array<i64: 4>}, {transform_indices = @transform_2, window_bounds = array<i64: 1, 4, 2, 128>}, {transform_indices = @transform_3, window_bounds = array<i64: 1, 4, 2, 128>}]} {
    %c0 = arith.constant 0 : index
    %c0_0 = arith.constant 0 : index
    %c0_1 = arith.constant 0 : index
    %c0_2 = arith.constant 0 : index
    %0 = vector.load %arg4[%c0, %c0_0, %c0_1, %c0_2] : memref<1x4x2x128xf32, #tpu.memory_space<vmem>>, vector<1x1x2x128xf32>
    %1 = vector.shape_cast %0 : vector<1x1x2x128xf32> to vector<2x128xf32>
    %c0_3 = arith.constant 0 : index
    %c1 = arith.constant 1 : index
    %c0_4 = arith.constant 0 : index
    %c0_5 = arith.constant 0 : index
    %2 = vector.load %arg4[%c0_3, %c1, %c0_4, %c0_5] : memref<1x4x2x128xf32, #tpu.memory_space<vmem>>, vector<1x1x2x128xf32>
    %3 = vector.shape_cast %2 : vector<1x1x2x128xf32> to vector<2x128xf32>
    %c0_6 = arith.constant 0 : index
    %c2 = arith.constant 2 : index
    %c0_7 = arith.constant 0 : index
    %c0_8 = arith.constant 0 : index
    %4 = vector.load %arg4[%c0_6, %c2, %c0_7, %c0_8] : memref<1x4x2x128xf32, #tpu.memory_space<vmem>>, vector<1x1x2x128xf32>
    %5 = vector.shape_cast %4 : vector<1x1x2x128xf32> to vector<2x128xf32>
    %c0_9 = arith.constant 0 : index
    %c3 = arith.constant 3 : index
    %c0_10 = arith.constant 0 : index
    %c0_11 = arith.constant 0 : index
    %6 = vector.load %arg4[%c0_9, %c3, %c0_10, %c0_11] : memref<1x4x2x128xf32, #tpu.memory_space<vmem>>, vector<1x1x2x128xf32>
    %7 = vector.shape_cast %6 : vector<1x1x2x128xf32> to vector<2x128xf32>
    %c0_12 = arith.constant 0 : index
    %8 = memref.load %arg3[%c0_12] : memref<4xf32, #tpu.memory_space<smem>>
    %c0_13 = arith.constant 0 : index
    %c0_14 = arith.constant 0 : index
    %9 = memref.load %arg2[%c0_13, %c0_14] : memref<4x4xf32, #tpu.memory_space<smem>>
    %10 = vector.broadcast %9 : f32 to vector<2x128xf32>
    %11 = arith.mulf %10, %1 : vector<2x128xf32>
    %12 = vector.broadcast %8 : f32 to vector<2x128xf32>
    %13 = arith.addf %12, %11 : vector<2x128xf32>
    %c0_15 = arith.constant 0 : index
    %c1_16 = arith.constant 1 : index
    %14 = memref.load %arg2[%c0_15, %c1_16] : memref<4x4xf32, #tpu.memory_space<smem>>
    %15 = vector.broadcast %14 : f32 to vector<2x128xf32>
    %16 = arith.mulf %15, %3 : vector<2x128xf32>
    %17 = arith.addf %13, %16 : vector<2x128xf32>
    %c0_17 = arith.constant 0 : index
    %c2_18 = arith.constant 2 : index
    %18 = memref.load %arg2[%c0_17, %c2_18] : memref<4x4xf32, #tpu.memory_space<smem>>
    %19 = vector.broadcast %18 : f32 to vector<2x128xf32>
    %20 = arith.mulf %19, %5 : vector<2x128xf32>
    %21 = arith.addf %17, %20 : vector<2x128xf32>
    %c0_19 = arith.constant 0 : index
    %c3_20 = arith.constant 3 : index
    %22 = memref.load %arg2[%c0_19, %c3_20] : memref<4x4xf32, #tpu.memory_space<smem>>
    %23 = vector.broadcast %22 : f32 to vector<2x128xf32>
    %24 = arith.mulf %23, %7 : vector<2x128xf32>
    %25 = arith.addf %21, %24 : vector<2x128xf32>
    %26 = arith.negf %25 : vector<2x128xf32>
    %27 = math.exp %26 : vector<2x128xf32>
    %cst = arith.constant 1.000000e+00 : f32
    %28 = vector.broadcast %cst : f32 to vector<2x128xf32>
    %29 = arith.addf %28, %27 : vector<2x128xf32>
    %30 = arith.divf %28, %29 : vector<2x128xf32>
    %31 = arith.mulf %1, %30 : vector<2x128xf32>
    %c0_21 = arith.constant 0 : index
    %c0_22 = arith.constant 0 : index
    %c0_23 = arith.constant 0 : index
    %c0_24 = arith.constant 0 : index
    %32 = vector.load %arg5[%c0_21, %c0_22, %c0_23, %c0_24] : memref<1x4x2x128xf32, #tpu.memory_space<vmem>>, vector<1x1x2x128xf32>
    %33 = vector.shape_cast %32 : vector<1x1x2x128xf32> to vector<2x128xf32>
    %34 = vector.shape_cast %31 : vector<2x128xf32> to vector<1x1x2x128xf32>
    tpu.vector_store %arg5[%c0_21, %c0_22, %c0_23, %c0_24], %34 {strides = array<i32>} : memref<1x4x2x128xf32, #tpu.memory_space<vmem>>, vector<1x1x2x128xf32>,
    %c1_25 = arith.constant 1 : index
    %35 = memref.load %arg3[%c1_25] : memref<4xf32, #tpu.memory_space<smem>>
    %c1_26 = arith.constant 1 : index
    %c0_27 = arith.constant 0 : index
    %36 = memref.load %arg2[%c1_26, %c0_27] : memref<4x4xf32, #tpu.memory_space<smem>>
    %37 = vector.broadcast %36 : f32 to vector<2x128xf32>
    %38 = arith.mulf %37, %1 : vector<2x128xf32>
    %39 = vector.broadcast %35 : f32 to vector<2x128xf32>
    %40 = arith.addf %39, %38 : vector<2x128xf32>
    %c1_28 = arith.constant 1 : index
    %c1_29 = arith.constant 1 : index
    %41 = memref.load %arg2[%c1_28, %c1_29] : memref<4x4xf32, #tpu.memory_space<smem>>
    %42 = vector.broadcast %41 : f32 to vector<2x128xf32>
    %43 = arith.mulf %42, %3 : vector<2x128xf32>
    %44 = arith.addf %40, %43 : vector<2x128xf32>
    %c1_30 = arith.constant 1 : index
    %c2_31 = arith.constant 2 : index
    %45 = memref.load %arg2[%c1_30, %c2_31] : memref<4x4xf32, #tpu.memory_space<smem>>
    %46 = vector.broadcast %45 : f32 to vector<2x128xf32>
    %47 = arith.mulf %46, %5 : vector<2x128xf32>
    %48 = arith.addf %44, %47 : vector<2x128xf32>
    %c1_32 = arith.constant 1 : index
    %c3_33 = arith.constant 3 : index
    %49 = memref.load %arg2[%c1_32, %c3_33] : memref<4x4xf32, #tpu.memory_space<smem>>
    %50 = vector.broadcast %49 : f32 to vector<2x128xf32>
    %51 = arith.mulf %50, %7 : vector<2x128xf32>
    %52 = arith.addf %48, %51 : vector<2x128xf32>
    %53 = arith.negf %52 : vector<2x128xf32>
    %54 = math.exp %53 : vector<2x128xf32>
    %cst_34 = arith.constant 1.000000e+00 : f32
    %55 = vector.broadcast %cst_34 : f32 to vector<2x128xf32>
    %56 = arith.addf %55, %54 : vector<2x128xf32>
    %57 = arith.divf %55, %56 : vector<2x128xf32>
    %58 = arith.mulf %3, %57 : vector<2x128xf32>
    %c0_35 = arith.constant 0 : index
    %c1_36 = arith.constant 1 : index
    %c0_37 = arith.constant 0 : index
    %c0_38 = arith.constant 0 : index
    %59 = vector.load %arg5[%c0_35, %c1_36, %c0_37, %c0_38] : memref<1x4x2x128xf32, #tpu.memory_space<vmem>>, vector<1x1x2x128xf32>
    %60 = vector.shape_cast %59 : vector<1x1x2x128xf32> to vector<2x128xf32>
    %61 = vector.shape_cast %58 : vector<2x128xf32> to vector<1x1x2x128xf32>
    tpu.vector_store %arg5[%c0_35, %c1_36, %c0_37, %c0_38], %61 {strides = array<i32>} : memref<1x4x2x128xf32, #tpu.memory_space<vmem>>, vector<1x1x2x128xf32>,
    %c2_39 = arith.constant 2 : index
    %62 = memref.load %arg3[%c2_39] : memref<4xf32, #tpu.memory_space<smem>>
    %c2_40 = arith.constant 2 : index
    %c0_41 = arith.constant 0 : index
    %63 = memref.load %arg2[%c2_40, %c0_41] : memref<4x4xf32, #tpu.memory_space<smem>>
    %64 = vector.broadcast %63 : f32 to vector<2x128xf32>
    %65 = arith.mulf %64, %1 : vector<2x128xf32>
    %66 = vector.broadcast %62 : f32 to vector<2x128xf32>
    %67 = arith.addf %66, %65 : vector<2x128xf32>
    %c2_42 = arith.constant 2 : index
    %c1_43 = arith.constant 1 : index
    %68 = memref.load %arg2[%c2_42, %c1_43] : memref<4x4xf32, #tpu.memory_space<smem>>
    %69 = vector.broadcast %68 : f32 to vector<2x128xf32>
    %70 = arith.mulf %69, %3 : vector<2x128xf32>
    %71 = arith.addf %67, %70 : vector<2x128xf32>
    %c2_44 = arith.constant 2 : index
    %c2_45 = arith.constant 2 : index
    %72 = memref.load %arg2[%c2_44, %c2_45] : memref<4x4xf32, #tpu.memory_space<smem>>
    %73 = vector.broadcast %72 : f32 to vector<2x128xf32>
    %74 = arith.mulf %73, %5 : vector<2x128xf32>
    %75 = arith.addf %71, %74 : vector<2x128xf32>
    %c2_46 = arith.constant 2 : index
    %c3_47 = arith.constant 3 : index
    %76 = memref.load %arg2[%c2_46, %c3_47] : memref<4x4xf32, #tpu.memory_space<smem>>
    %77 = vector.broadcast %76 : f32 to vector<2x128xf32>
    %78 = arith.mulf %77, %7 : vector<2x128xf32>
    %79 = arith.addf %75, %78 : vector<2x128xf32>
    %80 = arith.negf %79 : vector<2x128xf32>
    %81 = math.exp %80 : vector<2x128xf32>
    %cst_48 = arith.constant 1.000000e+00 : f32
    %82 = vector.broadcast %cst_48 : f32 to vector<2x128xf32>
    %83 = arith.addf %82, %81 : vector<2x128xf32>
    %84 = arith.divf %82, %83 : vector<2x128xf32>
    %85 = arith.mulf %5, %84 : vector<2x128xf32>
    %c0_49 = arith.constant 0 : index
    %c2_50 = arith.constant 2 : index
    %c0_51 = arith.constant 0 : index
    %c0_52 = arith.constant 0 : index
    %86 = vector.load %arg5[%c0_49, %c2_50, %c0_51, %c0_52] : memref<1x4x2x128xf32, #tpu.memory_space<vmem>>, vector<1x1x2x128xf32>
    %87 = vector.shape_cast %86 : vector<1x1x2x128xf32> to vector<2x128xf32>
    %88 = vector.shape_cast %85 : vector<2x128xf32> to vector<1x1x2x128xf32>
    tpu.vector_store %arg5[%c0_49, %c2_50, %c0_51, %c0_52], %88 {strides = array<i32>} : memref<1x4x2x128xf32, #tpu.memory_space<vmem>>, vector<1x1x2x128xf32>,
    %c3_53 = arith.constant 3 : index
    %89 = memref.load %arg3[%c3_53] : memref<4xf32, #tpu.memory_space<smem>>
    %c3_54 = arith.constant 3 : index
    %c0_55 = arith.constant 0 : index
    %90 = memref.load %arg2[%c3_54, %c0_55] : memref<4x4xf32, #tpu.memory_space<smem>>
    %91 = vector.broadcast %90 : f32 to vector<2x128xf32>
    %92 = arith.mulf %91, %1 : vector<2x128xf32>
    %93 = vector.broadcast %89 : f32 to vector<2x128xf32>
    %94 = arith.addf %93, %92 : vector<2x128xf32>
    %c3_56 = arith.constant 3 : index
    %c1_57 = arith.constant 1 : index
    %95 = memref.load %arg2[%c3_56, %c1_57] : memref<4x4xf32, #tpu.memory_space<smem>>
    %96 = vector.broadcast %95 : f32 to vector<2x128xf32>
    %97 = arith.mulf %96, %3 : vector<2x128xf32>
    %98 = arith.addf %94, %97 : vector<2x128xf32>
    %c3_58 = arith.constant 3 : index
    %c2_59 = arith.constant 2 : index
    %99 = memref.load %arg2[%c3_58, %c2_59] : memref<4x4xf32, #tpu.memory_space<smem>>
    %100 = vector.broadcast %99 : f32 to vector<2x128xf32>
    %101 = arith.mulf %100, %5 : vector<2x128xf32>
    %102 = arith.addf %98, %101 : vector<2x128xf32>
    %c3_60 = arith.constant 3 : index
    %c3_61 = arith.constant 3 : index
    %103 = memref.load %arg2[%c3_60, %c3_61] : memref<4x4xf32, #tpu.memory_space<smem>>
    %104 = vector.broadcast %103 : f32 to vector<2x128xf32>
    %105 = arith.mulf %104, %7 : vector<2x128xf32>
    %106 = arith.addf %102, %105 : vector<2x128xf32>
    %107 = arith.negf %106 : vector<2x128xf32>
    %108 = math.exp %107 : vector<2x128xf32>
    %cst_62 = arith.constant 1.000000e+00 : f32
    %109 = vector.broadcast %cst_62 : f32 to vector<2x128xf32>
    %110 = arith.addf %109, %108 : vector<2x128xf32>
    %111 = arith.divf %109, %110 : vector<2x128xf32>
    %112 = arith.mulf %7, %111 : vector<2x128xf32>
    %c0_63 = arith.constant 0 : index
    %c3_64 = arith.constant 3 : index
    %c0_65 = arith.constant 0 : index
    %c0_66 = arith.constant 0 : index
    %113 = vector.load %arg5[%c0_63, %c3_64, %c0_65, %c0_66] : memref<1x4x2x128xf32, #tpu.memory_space<vmem>>, vector<1x1x2x128xf32>
    %114 = vector.shape_cast %113 : vector<1x1x2x128xf32> to vector<2x128xf32>
    %115 = vector.shape_cast %112 : vector<2x128xf32> to vector<1x1x2x128xf32>
    tpu.vector_store %arg5[%c0_63, %c3_64, %c0_65, %c0_66], %115 {strides = array<i32>} : memref<1x4x2x128xf32, #tpu.memory_space<vmem>>, vector<1x1x2x128xf32>,
    return
  }
  func.func @transform_0(%arg0: i32, %arg1: i32) -> (i32, i32) {
    %c0_i32 = arith.constant 0 : i32
    %c0_i32_0 = arith.constant 0 : i32
    %c0_i32_1 = arith.constant 0 : i32
    return %c0_i32, %c0_i32_0 : i32, i32
  }
  func.func @transform_1(%arg0: i32, %arg1: i32) -> i32 {
    %c0_i32 = arith.constant 0 : i32
    %c0_i32_0 = arith.constant 0 : i32
    return %c0_i32 : i32
  }
  func.func @transform_2(%arg0: i32, %arg1: i32) -> (i32, i32, i32, i32) {
    %c0_i32 = arith.constant 0 : i32
    %c0_i32_0 = arith.constant 0 : i32
    %c0_i32_1 = arith.constant 0 : i32
    return %arg0, %c0_i32, %arg1, %c0_i32_0 : i32, i32, i32, i32
  }
  func.func @transform_3(%arg0: i32, %arg1: i32) -> (i32, i32, i32, i32) {
    %c0_i32 = arith.constant 0 : i32
    %c0_i32_0 = arith.constant 0 : i32
    %c0_i32_1 = arith.constant 0 : i32
    return %arg0, %c0_i32, %arg1, %c0_i32_0 : i32, i32, i32, i32
  }
}

</mosaic_0001>

<bundles_post_ra>
// kernel: tpu_custom_call.1
= control target key start
LH: loop header
LB: loop body
LE: loop exit
PB: predicated region body
PF: predicated region fallthrough
CT: control target
= control target key end

     0   :  { %s1014_s0 = inlined_call_operand.hbm [shape: f32[4,4], index: 0, kind: input, shape index: {}]   ;;  %s1015_s1 = inlined_call_operand.vmem [shape: f32[4], index: 1, kind: input, shape index: {}]   ;;  %s1016_s2 = inlined_call_operand.hbm [shape: f32[2,4,2,128], index: 2, kind: input, shape index: {}]   ;;  %s1017_s3 = inlined_call_operand.hbm [shape: f32[2,4,2,128], index: 3, kind: output, shape index: {}]  }
   0x1   :  { %1019 = sst [smem:[#allocation14_spill]] %s1014_s0 }
   0x2   :  { %8 = vsyncpa [#allocation5], 0 }
   0x3   :  { %9 = vsyncpa [#allocation6], 0 }
   0x4   :  { %10 = vsyncpa [#allocation3], 0 }
   0x5   :  { %12 = vsyncpa [#allocation3 + $0x1], 0 }
   0x6   :  { %13 = vsyncpa [#allocation4], 0 }
   0x7   :  { %15 = vsyncpa [#allocation4 + $0x1], 0  ;;  %s793_s12 = smov 0   ;;  %s795_s13 = smov 0  }
   0x8   :  { %s797_s14 = smov 0   ;;  %s799_s15 = smov 0  }
   0x9   :  { %s801_s16 = smov 0   ;;  %s803_s17 = smov 0  }
   0xa LB: > { %s469_s18 = sadd.s32 4294967295, %s763_s17   ;;  %s470_s19 = sadd.s32 4294967294, %s763_s17   ;;  %s763_s17 = sphi %s803_s17, %s21_s17   ;;  %s759_s16 = sphi %s801_s16, %s1035_s16   ;;  %s755_s15 = sphi %s799_s15, %s1034_s15   ;;  %s751_s14 = sphi %s797_s14, %s1033_s14   ;;  %s747_s13 = sphi %s795_s13, %s1032_s13   ;;  %s743_s12 = sphi %s793_s12, %s1031_s12  }
   0xb   : > { %s84_s20 = sadd.s32 1, %s751_s14  ;;  %p91_p0 = scmp.ne.s32.totalorder %s751_s14, %s747_s13 }
   0xc   : > { %p92_p1 = scmp.eq.s32.totalorder %s763_s17, 0  ;;  %p97_p2 = scmp.ne.s32.totalorder %s747_s13, %s743_s12 }
   0xd   : > { %p831_p3 = scmp.eq.s32.totalorder %s469_s18, 0  ;;  %p123_p4 = scmp.eq.s32.totalorder %s469_s18, 1 }
   0xe   : > { %p93_p5 = por %p92_p1, %p91_p0  ;;  %p129_p6 = scmp.eq.s32.totalorder %s470_s19, 1 }
   0xf   : > { %p837_p7 = por %p831_p3, %p97_p2  ;;  %p841_p8 = por %p123_p4, %p91_p0 }
  0x10   : > { %p845_p9 = por %p129_p6, %p97_p2  ;;  %p471_p10 = scmp.ge.s32.totalorder %s763_s17, 1 }
  0x11   : > { %s1022_s23 = scalar_select %p841_p8, 1, 0 }
  0x12   : > { %s1023_s24 = scalar_select %p845_p9, 1, 0 }
  0x13   : > { %p136_p11 = scmp.lt.s32.totalorder %s763_s17, 3  ;;  %p547_p1 = scmp.lt.s32.totalorder %s763_s17, 2 }
  0x14   : > { %s158_s28 = sshll.u32 %s1015_s1, 4  ;;  %s169_s4 = sand.u32 1, %s751_s14   ;;  %s159_s28 = int_to_ptr.vmem [resolvable:$true] %s158_s28 }
  0x15   : > { %p852_p13 = pnand %p471_p10, %p136_p11  ;;  %p862_p4 = pnand %p547_p1, %p93_p5 }
  0x16   : > { %s33_s5 = sadd.s32 1, %s759_s16  ;;  %s765_s6 = smov [#allocation2]  }
  0x17   : > { %p530_p0 = pneg %p852_p13  ;;  %s1027_s0 = sld [smem:[#allocation14_spill]] }
  0x18   : > { %s632_s9 = scalar_lea.vmem %s159_s28, 16  ;;  %p640_p1 = scmp.lt.s32.totalorder %s159_s28, %s159_s28 }
  0x19   : > { %p868_p2 = pnand %p530_p0, %p831_p3  ;;  %p633_p5 = scmp.ne.s32.totalorder %s159_s28, %s632_s9 }
  0x1a   : > { %p641_p0 = scmp.lt.s32.totalorder %s632_s9, %s632_s9 }
  0x1b   : > { %p634_p6 = pneg %p868_p2 }
  0x1c   : > { %p642_p12 = por %p641_p0, %p640_p1 }
  0x1d   : > { %533 = dma.hbm_to_smem (!%p868_p2), %s1027_s0, 64, %s765_s6, [#allocation5]  }
  0x1e   : > { %p635_p10 = pnand %p634_p6, %p633_p5 }
  0x20   : > { %p636_p11 = pneg %p635_p10 }
  0x22   : > { %p643_p9 = pnand %p642_p12, %p636_p11 }
  0x24   : > { %646 = shalt.err (!%p643_p9)
}
  0x25   : > { %s766_s10 = smov [#allocation7]   ;;  %p35_p8 = scmp.ge.s32.totalorder %s33_s5, 2 }
  0x26   : > { %536 = dma.vmem_to_smem (!%p868_p2), %s159_s28, 16, %s766_s10, [#allocation6]  }
  0x27   : > { %s475_s11 = sshll.u32 %s169_s4, 3  ;;  %s516_s18 = sshll.u32 %s759_s16, 7 }
  0x28   : > { %s1037_s5 = smov (%p35_p8, %s33_s5), 0  ;;  %s180_s27 = scalar_lea.hbm %s1016_s2, %s516_s18 }
  0x29   : > { %s79_s6 = ssub.s32 %s759_s16, %s1037_s5  ;;  %s173_s7 = scalar_lea.vmem [#allocation8], %s475_s11 }
  0x2a   : > { %s181_s8 = sshll.u32 %s173_s7, 4  ;;  %p82_p9 = scmp.eq.s32.totalorder %s79_s6, 0  ;;  %s182_s8 = int_to_ptr.vmem [resolvable:$true] %s181_s8 }
  0x2b   : > { %s170_s9 = scalar_lea.sflag [#allocation3], %s169_s4  ;;  %p649_p12 = pneg %p862_p4 }
  0x2c   : > { %s894_s30 = scalar_select %p82_p9, %s751_s14, %s84_s20  }
  0x2d   : > { %s660_s28 = scalar_lea.vmem %s182_s8, 128  ;;  %s767_s10 = smov [#allocation8]  }
  0x2e   : > { %p661_p2 = scmp.ne.s32.totalorder %s182_s8, %s660_s28  ;;  %s665_s0 = sshll.u32 %s767_s10, 4  ;;  %s666_s0 = int_to_ptr.vmem [resolvable:$false] %s665_s0 }
  0x2f   : > { %s667_s19 = scalar_lea.vmem %s666_s0, 256  ;;  %p668_p6 = scmp.lt.s32.totalorder %s182_s8, %s666_s0 }
  0x30   : > { %p663_p8 = pnand %p661_p2, %p649_p12  ;;  %p669_p10 = scmp.lt.s32.totalorder %s667_s19, %s660_s28 }
  0x32   : > { %p664_p5 = pneg %p663_p8  ;;  %p670_p11 = por %p669_p10, %p668_p6 }
  0x34   : > { %p671_p1 = pnand %p670_p11, %p664_p5 }
  0x36   : > { %674 = shalt.err (!%p671_p1)
}
  0x37   : > { %s768_s11 = smov 32   ;;  %s769_s20 = smov 2  }
  0x38   : > { %540 = dma.hbm_to_vmem [thread:$0]  (!%p862_p4), %s180_s27, 128, %s182_s8, %s170_s9, %s768_s11, %s768_s11, %s769_s20  }
  0x39   : > { %193 = sbr.rel (%p852_p13) target bundleno = 150 (0x96), region = 32 }
  0x3e   : > { %726 = dma.done.wait (%p831_p3), [#allocation5], 64  }
  0x3f   : > { %728 = vsyncadd (%p831_p3), [#allocation5], 4294967232 }
  0x40   : > { %730 = dma.done.wait (%p831_p3), [#allocation6], 16  }
  0x41   : > { %732 = vsyncadd (%p831_p3), [#allocation6], 4294967280  ;;  %s911_s0 = sand.u32 1, %s747_s13  }
  0x42   : > { %s481_s25 = sshll.u32 %s911_s0, 3  ;;  %s204_s29 = scalar_lea.sflag [#allocation3], %s911_s0 }
  0x43   : > { %s207_s4 = scalar_lea.vmem [#allocation8], %s481_s25 }
  0x44   : > { %734 = dma.done.wait (%p837_p7), %s204_s29, 128  }
  0x45   : > { %736 = vsyncadd (%p837_p7), %s204_s29, 4294967168 }
  0x46   : > { %212 = sfence }
  0x47   : > { %s238_s18 = sld [smem:[#allocation7]]  ;;  %v921_v0 = vld [vmem:[%s207_s4] sm:$0x3]  ;;  %v925_v1 = vld [vmem:[%s207_s4 + $0x2] sm:$0x3]  ;;  %p1028_p7 = scmp.ne.s32.totalorder %s1022_s23, 0 }
  0x48   : > { %s239_s21 = sld [smem:[#allocation2]]  ;;  %v927_v2 = vld [vmem:[%s207_s4 + $0x4] sm:$0x3]  ;;  %v930_v7 = vld [vmem:[%s207_s4 + $0x6] sm:$0x3] }
  0x49   : > { %s486_s26 = sld [smem:[#allocation2 + $0x1]] }
  0x4a   : > { %s487_s27 = sld [smem:[#allocation2 + $0x2]] }
  0x4b   : > { %s488_s6 = sld [smem:[#allocation2 + $0x3]] }
  0x4c   : > { %s923_s7 = sld [smem:[#allocation7 + $0x1]] }
  0x4d   : > { %s491_s8 = sld [smem:[#allocation2 + $0x80]]  ;;  %v242_v4 = vstv %s238_s18 }
  0x4e   : > { %v240_v3 = vstv %s239_s21  ;;  %s492_s9 = sld [smem:[#allocation2 + $0x81]] }
  0x4f   : > { %v241_v5 = vmul.f32 %v240_v3, %v921_v0  ;;  %v245_v6 = vstv %s486_s26  ;;  %s493_s22 = sld [smem:[#allocation2 + $0x82]] }
  0x50   : > { %v246_v8 = vmul.f32 %v925_v1, %v245_v6  ;;  %v249_v9 = vstv %s487_s27  ;;  %s933_s28 = sld [smem:[#allocation7 + $0x2]] }
  0x51   : > { %v243_v10 = vadd.f32 %v242_v4, %v241_v5  ;;  %v250_v11 = vmul.f32 %v927_v2, %v249_v9  ;;  %v253_v12 = vstv %s488_s6  ;;  %s498_s10 = sld [smem:[#allocation2 + $0x100]]  ;;  %s230_s6 = scalar_lea.vmem [#allocation9], %s481_s25 }
  0x52   : > { %s499_s19 = sld [smem:[#allocation2 + $0x101]]  ;;  %v254_v14 = vmul.f32 %v930_v7, %v253_v12  ;;  %v268_v16 = vstv %s923_s7  ;;  %s360_s7 = sshll.u32 %s230_s6, 4  ;;  %s960_s7 = int_to_ptr.vmem [resolvable:$true] %s360_s7 }
  0x53   : > { %v247_v13 = vadd.f32 %v246_v8, %v243_v10  ;;  %v266_v15 = vstv %s491_s8  ;;  %s500_s11 = sld [smem:[#allocation2 + $0x102]]  ;;  %s517_s8 = sshll.u32 %s755_s15, 7 }
  0x54   : > { %v267_v17 = vmul.f32 %v266_v15, %v921_v0  ;;  %v271_v18 = vstv %s492_s9  ;;  %s939_s20 = sld [smem:[#allocation7 + $0x3]]  ;;  %s965_s25 = scalar_lea.hbm %s1017_s3, %s517_s8 }
  0x55   : > { %v251_v19 = vadd.f32 %v250_v11, %v247_v13  ;;  %v272_v20 = vmul.f32 %v925_v1, %v271_v18  ;;  %v275_v21 = vstv %s493_s22  ;;  %s505_s29 = sld [smem:[#allocation2 + $0x180]]  ;;  %s346_s15 = scalar_lea.sflag [#allocation4], %s911_s0 }
  0x56   : > { %v269_v22 = vadd.f32 %v268_v16, %v267_v17  ;;  %s506_s4 = sld [smem:[#allocation2 + $0x181]]  ;;  %v295_v25 = vstv %s933_s28  ;;  %v276_v26 = vmul.f32 %v927_v2, %v275_v21  ;;  %s675_s28 = scalar_lea.vmem %s960_s7, 128 }
  0x57   : > { %v255_v23 = vadd.f32 %v254_v14, %v251_v19  ;;  %v293_v24 = vstv %s498_s10  ;;  %s507_s18 = sld [smem:[#allocation2 + $0x182]]  ;;  %p676_p3 = scmp.ne.s32.totalorder %s960_s7, %s675_s28 }
  0x58   : > { %v294_v27 = vmul.f32 %v293_v24, %v921_v0  ;;  %v298_v28 = vstv %s499_s19  ;;  %s494_s21 = sld [smem:[#allocation2 + $0x83]]  ;;  %v273_v30 = vadd.f32 %v272_v20, %v269_v22  ;;  %s770_s10 = smov [#allocation9]  }
  0x59   : > { %v489_v29 = vmul.f32 -1.442695, %v255_v23  ;;  %v299_v31 = vmul.f32 %v925_v1, %v298_v28  ;;  %v302_v32 = vstv %s500_s11  ;;  %s501_s26 = sld [smem:[#allocation2 + $0x103]]  ;;  %p677_p13 = pnand %p676_p3, %p1028_p7 }
  0x5a   : > { %v296_v33 = vadd.f32 %v295_v25, %v294_v27  ;;  %v303_v34 = vmul.f32 %v927_v2, %v302_v32  ;;  %s508_s27 = sld [smem:[#allocation2 + $0x183]]  ;;  %v322_v36 = vstv %s939_s20  ;;  %v277_v40 = vadd.f32 %v276_v26, %v273_v30  ;;  %s679_s19 = sshll.u32 %s770_s10, 4  ;;  %s680_s19 = int_to_ptr.vmem [resolvable:$false] %s679_s19 }
  0x5b   : > { %605 = vpow2.f32 %v489_v29  ;;  %v320_v35 = vstv %s505_s29  ;;  %p678_p4 = pneg %p677_p13  ;;  %s681_s11 = scalar_lea.vmem %s680_s19, 256 }
  0x5c   : > { %v300_v37 = vadd.f32 %v299_v31, %v296_v33  ;;  %v321_v38 = vmul.f32 %v320_v35, %v921_v0  ;;  %v325_v39 = vstv %s506_s4  ;;  %p682_p0 = scmp.lt.s32.totalorder %s960_s7, %s680_s19  ;;  %p683_p9 = scmp.lt.s32.totalorder %s681_s11, %s675_s28 }
  0x5d   : > { %v326_v41 = vmul.f32 %v925_v1, %v325_v39  ;;  %v329_v42 = vstv %s507_s18 }
  0x5e   : > { %v304_v43 = vadd.f32 %v303_v34, %v300_v37  ;;  %v323_v44 = vadd.f32 %v322_v36, %v321_v38  ;;  %v330_v45 = vmul.f32 %v927_v2, %v329_v42  ;;  %v279_v46 = vstv %s494_s21  ;;  %p684_p12 = por %p683_p9, %p682_p0 }
  0x5f   : > { %v280_v47 = vmul.f32 %v930_v7, %v279_v46  ;;  %v306_v48 = vstv %s501_s26 }
  0x60   : > { %v327_v49 = vadd.f32 %v326_v41, %v323_v44  ;;  %v307_v50 = vmul.f32 %v930_v7, %v306_v48  ;;  %v333_v51 = vstv %s508_s27  ;;  %p685_p2 = pnand %p684_p12, %p678_p4 }
  0x61   : > { %v281_v52 = vadd.f32 %v280_v47, %v277_v40  ;;  %v334_v53 = vmul.f32 %v930_v7, %v333_v51 }
  0x62   : > { %v331_v54 = vadd.f32 %v330_v45, %v327_v49  ;;  %v308_v55 = vadd.f32 %v307_v50, %v304_v43 }
  0x63   : > { %v495_v56 = vmul.f32 -1.442695, %v281_v52 }
  0x64   : > { %v502_v57 = vmul.f32 -1.442695, %v308_v55  ;;  %v335_v58 = vadd.f32 %v334_v53, %v331_v54 }
  0x65   : > { %607 = vpow2.f32 %v495_v56 }
  0x66   : > { %609 = vpow2.f32 %v502_v57  ;;  %v509_v59 = vmul.f32 -1.442695, %v335_v58 }
  0x68   : > { %v606_v60 = vpop.eup %605  ;;  %611 = vpow2.f32 %v509_v59 }
  0x69   : > { %v259_v61 = vadd.f32 1.0, %v606_v60 }
  0x6b   : > { %613 = vrcp.f32 %v259_v61 }
  0x72   : > { %v608_v62 = vpop.eup %607 }
  0x73   : > { %v610_v63 = vpop.eup %609  ;;  %v285_v3 = vadd.f32 1.0, %v608_v62 }
  0x74   : > { %v312_v4 = vadd.f32 1.0, %v610_v63 }
  0x75   : > { %v612_v5 = vpop.eup %611  ;;  %615 = vrcp.f32 %v285_v3 }
  0x76   : > { %617 = vrcp.f32 %v312_v4  ;;  %v339_v6 = vadd.f32 1.0, %v612_v5 }
  0x78   : > { %v614_v8 = vpop.eup %613  ;;  %619 = vrcp.f32 %v339_v6 }
  0x79   : > { %v262_v9 = vmul.f32 %v614_v8, %v921_v0 }
  0x7b   : > { %263 = vst [vmem:[%s230_s6] sm:$0x3] %v262_v9 }
  0x82   : > { %v616_v10 = vpop.eup %615 }
  0x83   : > { %v618_v11 = vpop.eup %617  ;;  %v288_v12 = vmul.f32 %v616_v10, %v925_v1 }
  0x84   : > { %v315_v13 = vmul.f32 %v618_v11, %v927_v2 }
  0x85   : > { %v620_v14 = vpop.eup %619  ;;  %496 = vst [vmem:[%s230_s6 + $0x2] sm:$0x3] %v288_v12 }
  0x86   : > { %503 = vst [vmem:[%s230_s6 + $0x4] sm:$0x3] %v315_v13  ;;  %v342_v0 = vmul.f32 %v620_v14, %v930_v7 }
  0x88   : > { %510 = vst [vmem:[%s230_s6 + $0x6] sm:$0x3] %v342_v0 }
  0x89   : > { %688 = shalt.err (!%p685_p2)
}
  0x8a   : > { %s689_s20 = scalar_lea.hbm %s965_s25, 128  ;;  %s693_s18 = scalar_lea.hbm %s1017_s3, 256 }
  0x8b   : > { %p690_p8 = scmp.ne.s32.totalorder %s965_s25, %s689_s20  ;;  %p694_p10 = scmp.lt.s32.totalorder %s965_s25, %s1017_s3 }
  0x8c   : > { %p695_p11 = scmp.lt.s32.totalorder %s693_s18, %s689_s20 }
  0x8d   : > { %p691_p5 = pnand %p690_p8, %p1028_p7 }
  0x8e   : > { %p696_p1 = por %p695_p11, %p694_p10 }
  0x8f   : > { %p692_p6 = pneg %p691_p5 }
  0x91   : > { %p697_p3 = pnand %p696_p1, %p692_p6 }
  0x93   : > { %700 = shalt.err (!%p697_p3)
}
  0x94   : > { %s771_s27 = smov 32   ;;  %s772_s6 = smov 2  }
  0x95   : > { %528 = dma.vmem_to_hbm [thread:$0]  (%p1028_p7), %s960_s7, 128, %s965_s25, %s346_s15, %s771_s27, %s771_s27, %s772_s6  }
  0x96 PF: > { %s375_s8 = sand.u32 1, %s743_s12   ;;  %p1029_p13 = scmp.ne.s32.totalorder %s1023_s24, 0 }
  0x97   : > { %p1030_p4 = scmp.ge.s32.totalorder %s763_s17, 2  ;;  %s376_s9 = scalar_lea.sflag [#allocation4], %s375_s8 }
  0x99   : > { %p542_p0 = pnand %p1030_p4, %p1029_p13 }
  0x9b   : > { %p543_p9 = pneg %p542_p0 }
  0x9d   : > { %738 = dma.done.wait (%p543_p9), %s376_s9, 128  }
  0x9e   : > { %740 = vsyncadd (%p543_p9), %s376_s9, 4294967168  ;;  %s21_s17 = sadd.s32 1, %s763_s17   ;;  %s1031_s12 = smov %s747_s13 }
  0x9f   : > { %p18_p12 = scmp.ge.s32.totalorder %s21_s17, 4   ;;  %s1032_s13 = smov %s751_s14 }
  0xa0   : > { %s1033_s14 = smov %s894_s30  ;;  %s1034_s15 = smov %s759_s16 }
  0xa1   : > { %s1035_s16 = smov %s1037_s5  ;;  %20 = sbr.rel (!%p18_p12) target bundleno = 10 (0xa), region = 93 }
  0xa6   :  { %381 = vsyncpa [#allocation3], 1 }
  0xa7   :  { %383 = vsyncpa [#allocation3 + $0x1], 1 }
  0xa8   :  { %384 = vsyncpa [#allocation4], 1 }
  0xa9   :  { %386 = vsyncpa [#allocation4 + $0x1], 1 }
  0xaa   :  { %387 = vsyncpa [#allocation5], 1 }
  0xab   :  { %389 = vsyncpa [#allocation5 + $0x1], 1 }
  0xac   :  { %390 = vsyncpa [#allocation6], 1 }
  0xad   :  { %392 = vsyncpa [#allocation6 + $0x1], 1 }

</bundles_post_ra>
